<compile_context>
chip_gen: v6e
topology: v6e:2x2x1
jax: 0.10.0
libtpu: 0.0.40
codegen_flags: <defaults>
</compile_context>

<pallas_src>
import jax
import jax.numpy as jnp
from jax.experimental import pallas as pl
from jax.experimental.pallas import tpu as pltpu


# ----------------------------------------------------------------------------
# Demonstration Pallas kernel: direct HBM -> HBM DMA copy (no VMEM bounce).
# ----------------------------------------------------------------------------
def _hbm_copy_kernel(x_hbm_ref, o_hbm_ref, sem):
    # One DMA descriptor covering the whole array: HBM -> HBM at full
    # bandwidth on every TPU generation; no vregs, no VMEM, no grid steps.
    cp = pltpu.make_async_copy(x_hbm_ref, o_hbm_ref, sem)
    cp.start()
    cp.wait()


def pallas_copy(x: jax.Array) -> jax.Array:
    """Materialized copy of an array via one direct HBM->HBM DMA."""
    return pl.pallas_call(
        _hbm_copy_kernel,
        out_shape=jax.ShapeDtypeStruct(x.shape, x.dtype),
        in_specs=[pl.BlockSpec(memory_space=pl.ANY)],   # raw HBM ref, no auto-DMA
        out_specs=pl.BlockSpec(memory_space=pl.ANY),    # raw HBM ref, no auto-DMA
        scratch_shapes=[pltpu.SemaphoreType.DMA],       # completion semaphore
    )(x)


def pallas_identity(x: jax.Array) -> jax.Array:
    """Identity.

    Per the performance review: for identity semantics the only optimization
    that matters is to not move any bytes at all, so no kernel is launched —
    the input is returned as-is (0 bytes of HBM traffic).
    """
    return x


# ----------------------------------------------------------------------------
# JAX mirror of the PyTorch module.  Semantics match exactly:
#   - __init__: no parameters.
#   - forward(): takes no inputs, performs no computation, returns None.
# ----------------------------------------------------------------------------
class SetTransformer:
    def __init__(self):
        # Reference module defines no parameters.
        pass

    def forward(self):
        # Reference module's forward is `pass` -> returns None.
        return None

    def __call__(self):
        return self.forward()


if __name__ == "__main__":
    # Deterministic small example input (only used by the demo kernel; the
    # reference forward itself consumes no inputs).  Lane-dense last dim
    # (multiple of 128) kept for good measure, though the raw-HBM DMA path
    # has no layout requirement.
    key = jax.random.PRNGKey(0)
    x = jax.random.normal(key, (128, 256), dtype=jnp.float32)

    # Run the Pallas kernel once and block on the result.
    y = pallas_copy(x)
    jax.block_until_ready(y)
    assert y.shape == x.shape and y.dtype == x.dtype
    assert bool(jnp.array_equal(y, x))  # a copy must be bit-exact

    # Arbitrary (non-(8,128)-aligned) shape: the raw HBM->HBM DMA has no
    # block-shape constraint, so this also just works.
    x_odd = jax.random.normal(jax.random.PRNGKey(1), (13, 37), dtype=jnp.float32)
    y_odd = pallas_copy(x_odd)
    jax.block_until_ready(y_odd)
    assert bool(jnp.array_equal(y_odd, x_odd))

    # Zero-traffic identity path: no kernel, same buffer back.
    z = pallas_identity(x)
    assert z is x

    # Exercise the (empty) SetTransformer forward exactly as defined.
    model = SetTransformer()
    out = model.forward()
    assert out is None  # matches PyTorch: forward() returns None

    print("KERNEL_OK")
</pallas_src>

<mosaic_0001>
module attributes {stable_mosaic.version = 11 : i64} {
  func.func @_hbm_copy_kernel(%arg0: memref<128x256xf32, #tpu.memory_space<any>>, %arg1: memref<128x256xf32, #tpu.memory_space<any>>, %arg2: memref<!tpu.dma_semaphore, #tpu.memory_space<semaphore_mem>>) attributes {dimension_semantics = [], scalar_prefetch = 0 : i64, scratch_operands = 1 : i64, tpu.core_type = #tpu.core_type<tc>} {
    tpu.enqueue_dma source(%arg0 : memref<128x256xf32, #tpu.memory_space<any>>) target(%arg1 : memref<128x256xf32, #tpu.memory_space<any>>) target_semaphore(%arg2 : memref<!tpu.dma_semaphore, #tpu.memory_space<semaphore_mem>>)
    tpu.wait_dma2 semaphore(%arg2 : memref<!tpu.dma_semaphore, #tpu.memory_space<semaphore_mem>>) src(%arg0 : memref<128x256xf32, #tpu.memory_space<any>>) dst(%arg1 : memref<128x256xf32, #tpu.memory_space<any>>)
    return
  }
}

</mosaic_0001>

<bundles_post_ra>
// kernel: tpu_custom_call.1
= control target key start
LH: loop header
LB: loop body
LE: loop exit
PB: predicated region body
PF: predicated region fallthrough
CT: control target
= control target key end

     0   :  { %s29_s6 = smov [#allocation2]   ;;  %s30_s7 = smov 131072   ;;  %s48_s0 = inlined_call_operand.hbm [shape: f32[128,256], index: 0, kind: input, shape index: {}]   ;;  %s49_s1 = inlined_call_operand.hbm [shape: f32[128,256], index: 1, kind: output, shape index: {}]  }
   0x1   :  { %s31_s8 = smov 0  }
   0x2   :  { %12 = dma.general %s48_s0, 4096, %s49_s1, %s29_s6, %s30_s7, [#allocation4], %s31_s8, 0  }
   0x3   :  { %27 = dma.done.wait [#allocation2], 4096 }
   0x4   :  { %28 = vsyncadd [#allocation2], 4294963200 }
   0x5   :  { %17 = vsyncmov [#allocation2] }
   0x8   :  { %s18_s13 = vpop.sfrf %17 }
   0x9   :  { %p23_p0 = scmp.ne.s32.totalorder %s18_s13, 0 }
   0xb   :  { %22 = shalt.err (%p23_p0)  }

</bundles_post_ra>
